<compile_context>
chip_gen: v6e
topology: v6e:2x2x1
jax: 0.10.0
libtpu: 0.0.40
codegen_flags: <defaults>
</compile_context>

<pallas_src>
import functools

import jax
import jax.numpy as jnp
from jax.experimental import pallas as pl
from jax.experimental.pallas import tpu as pltpu

A = 20200.0 / 10000
B = 201.0 / 10000
C = 20201.0 / 10000


def _nlayer_kernel(x_ref, y_ref, s_ref, acc_ref, *, g):
    j = pl.program_id(1)

    @pl.when(j == 0)
    def _init():
        acc_ref[...] = jnp.zeros_like(acc_ref)

    xf = x_ref[...].astype(jnp.float32)       # one upcast; all math in f32
    a = jnp.abs(xf)
    ab = a + B
    t = ab * ab + (A * A)                     # (|x| + B)^2 + A^2
    inv_r = jax.lax.rsqrt(t)                  # single EUP op feeds sqrt AND der
    r = t * inv_r                             # sqrt(t) via a VPU multiply

    # func(x) = (r - C) * sign(x).  C == sqrt(A^2 + B^2) exactly, so r - C >= 0
    # and the sign is applied by OR-ing x's sign bit (2 bit ops) instead of
    # jnp.sign's compare/compare/select chain plus a multiply.  One select
    # keeps func(0) == 0 bit-exactly (torch.sign(0) == 0).
    sign_bit = pltpu.bitcast(xf, jnp.uint32) & jnp.uint32(0x80000000)
    y_mag = r - C
    y_signed = pltpu.bitcast(pltpu.bitcast(y_mag, jnp.uint32) | sign_bit,
                             jnp.float32)
    y_ref[...] = jnp.where(xf == 0.0, 0.0, y_signed).astype(y_ref.dtype)

    # der(x) = ab * inv_r, strictly positive -> no abs inside the log.
    # Group products of g lane-aligned slabs (pure VPU multiplies, no cross-lane
    # movement) cut the EUP log count by g x.  der in (B/C, 1) so products of
    # up to 8 terms stay >= ~1e-16, far from f32 underflow.
    der = ab * inv_r
    if g > 1:
        w = der.shape[1] // g
        prod = der[:, :w]
        for k in range(1, g):
            prod = prod * der[:, k * w:(k + 1) * w]
    else:
        prod = der
    # Lane-dense accumulation across the feature axis.
    acc_ref[...] += jnp.log(prod)

    @pl.when(j == pl.num_programs(1) - 1)
    def _finish():
        # One XLU cross-lane reduce + one narrow (tb, 1) store per row tile.
        s_ref[...] = jnp.sum(acc_ref[...], axis=1, keepdims=True)


def _tpu_params():
    """Returns (vmem_capacity_bytes, tensorcores_per_chip) with safe fallbacks."""
    vmem_cap = 64 << 20          # conservative default (v7x-sized VMEM)
    num_tc = 1
    try:
        info = pltpu.get_tpu_info()
        vmem_cap = int(getattr(info, "vmem_capacity_bytes", vmem_cap))
        # 64 MiB-per-TC VMEM is the 2-TC-per-chip generation (v7x);
        # v5e/v6e expose 128 MiB and have a single TensorCore.
        num_tc = 2 if vmem_cap <= (64 << 20) else 1
    except Exception:
        pass
    return vmem_cap, max(1, num_tc)


def _legal_tb(tb, bsz, sub):
    """Clamp a row-tile candidate to a (sub-multiple or full-dim) legal size."""
    tb = max(1, min(int(tb), bsz))
    if tb >= bsz:
        return bsz
    if tb < sub:
        return min(sub, bsz)
    return (tb // sub) * sub


def nlayer_forward(x, *, block_bytes=None, row_tile=None, col_tile=None):
    """Pallas implementation of nLayer.forward for 2D input (batch, n).

    Returns (func(x), logdet); logdet is float32 of shape (batch,).
    """
    bsz, n = x.shape
    itemsize = jnp.dtype(x.dtype).itemsize
    sub = {4: 8, 2: 16, 1: 32}.get(itemsize, 8)   # sublane packing granularity

    vmem_cap, num_tc = _tpu_params()

    # ---- per-block byte budget (generation aware) ----
    # Target in-flight footprint ~4*x_blk <= ~40-48% of VMEM; clamp user values
    # too, so a large block_bytes can never blow the v7x 64 MiB budget.
    max_blk = vmem_cap // 8
    if block_bytes is None:
        block_bytes = min(12 << 20, vmem_cap // 10)
    block_bytes = max(64 << 10, min(int(block_bytes), max_blk))

    # ---- feature (lane) tile: must divide n exactly so padded columns can
    #      never pollute the row-wise log-det sums ----
    if (col_tile is not None and n % col_tile == 0
            and (col_tile == n or col_tile % 128 == 0)):
        tn = int(col_tile)
    elif n * itemsize * sub <= block_bytes:
        tn = n                        # full contiguous rows -> best DMA pattern
    else:
        # Rows too wide for a full-row block: largest 128-multiple divisor of n
        # that still leaves at least `sub` rows per block.
        max_tn = max(128, block_bytes // (sub * itemsize))
        tn = n
        if n % 128 == 0:
            best = 0
            for cand in range(128, min(n, max_tn) + 1, 128):
                if n % cand == 0:
                    best = cand
            if best:
                tn = best

    # ---- row tile ----
    if row_tile is not None:
        tb = _legal_tb(row_tile, bsz, sub)
    else:
        tb = _legal_tb(block_bytes // max(1, tn * itemsize), bsz, sub)
        # 2-TC chips (v7x): give both TensorCores row tiles to work on.
        if num_tc > 1 and bsz >= num_tc * sub:
            tiles = -(-bsz // tb)
            if tiles % num_tc != 0:
                tiles = ((tiles + num_tc - 1) // num_tc) * num_tc
                tb = _legal_tb(-(-bsz // tiles), bsz, sub)
    # Keep the block within the per-block byte cap even with user overrides.
    while tb * tn * itemsize > max_blk and tb > sub and tb > 1:
        tb = _legal_tb(tb // 2, bsz, sub)

    # ---- log-group size: largest g in (8,4,2) with lane-aligned slabs ----
    g = 1
    for cand in (8, 4, 2):
        if tn % (cand * 128) == 0:
            g = cand
            break
    w_acc = tn // g

    grid = (pl.cdiv(bsz, tb), n // tn)

    # Explicit VMEM budget: double-buffered x/y blocks + lane-dense accumulator
    # + (lane-padded) (tb, 1) log-det blocks + headroom, capped under VMEM.
    x_blk = tb * tn * itemsize
    acc_blk = tb * w_acc * 4
    col_blk = tb * 128 * 4
    vmem_limit = 4 * x_blk + acc_blk + 2 * col_blk + (8 << 20)
    vmem_limit = int(min(max(vmem_limit, 32 << 20), vmem_cap - (8 << 20)))

    kernel = functools.partial(_nlayer_kernel, g=g)

    y, s = pl.pallas_call(
        kernel,
        out_shape=(
            jax.ShapeDtypeStruct((bsz, n), x.dtype),
            jax.ShapeDtypeStruct((bsz, 1), jnp.float32),
        ),
        grid_spec=pltpu.PrefetchScalarGridSpec(
            num_scalar_prefetch=0,
            grid=grid,
            in_specs=[pl.BlockSpec((tb, tn), lambda i, j: (i, j))],
            out_specs=[
                pl.BlockSpec((tb, tn), lambda i, j: (i, j)),
                pl.BlockSpec((tb, 1), lambda i, j: (i, 0)),
            ],
            scratch_shapes=[pltpu.VMEM((tb, w_acc), jnp.float32)],
        ),
        compiler_params=pltpu.CompilerParams(
            dimension_semantics=("parallel", "arbitrary"),
            vmem_limit_bytes=vmem_limit,
        ),
    )(x)
    return y, s[:, 0]  # second output is (batch,), matching torch.sum(..., 1)


def _reference(x):
    """Pure-JAX reference identical to the PyTorch forward."""
    xf = x.astype(jnp.float32)
    a = jnp.abs(xf)
    ab = a + B
    r = jnp.sqrt(ab * ab + A * A)
    y = ((r - C) * jnp.sign(xf)).astype(x.dtype)
    d = ab / r
    return y, jnp.sum(jnp.log(jnp.abs(d)), axis=1)


if __name__ == "__main__":
    # nLayer(n=256); input (batch, n) = (32, 256)
    key = jax.random.PRNGKey(0)
    x = jax.random.normal(key, (32, 256), dtype=jnp.float32)

    # 1) default (auto-sized, full-row block, grouped log products)
    y, logdet = nlayer_forward(x)
    jax.block_until_ready((y, logdet))

    # 2) forced multi-tile 2-D grid (exercises cross-feature-tile lane-dense accumulation)
    y2, logdet2 = nlayer_forward(x, row_tile=8, col_tile=128)
    jax.block_until_ready((y2, logdet2))

    # 3) bf16 input (exercises the single-upcast path and 16-row sublane packing)
    xb = x.astype(jnp.bfloat16)
    y3, logdet3 = nlayer_forward(xb)
    jax.block_until_ready((y3, logdet3))

    y_ref, logdet_ref = _reference(x)
    yb_ref, logdetb_ref = _reference(xb)

    assert y.shape == (32, 256) and logdet.shape == (32,)
    assert jnp.allclose(y, y_ref, atol=1e-5, rtol=1e-5)
    assert jnp.allclose(logdet, logdet_ref, atol=1e-3, rtol=1e-5)
    assert jnp.allclose(y2, y_ref, atol=1e-5, rtol=1e-5)
    assert jnp.allclose(logdet2, logdet_ref, atol=1e-3, rtol=1e-5)
    assert y3.dtype == jnp.bfloat16 and logdet3.dtype == jnp.float32
    assert jnp.allclose(y3.astype(jnp.float32), yb_ref.astype(jnp.float32),
                        atol=2e-2, rtol=2e-2)
    assert jnp.allclose(logdet3, logdetb_ref, atol=1e-2, rtol=1e-3)

    print("KERNEL_OK")
</pallas_src>

<mosaic_0001>
module attributes {stable_mosaic.version = 11 : i64} {
  func.func @_nlayer_kernel(%arg0: i32, %arg1: i32, %arg2: memref<32x256xf32, #tpu.memory_space<vmem>>, %arg3: memref<32x256xf32, #tpu.memory_space<vmem>>, %arg4: memref<32x1xf32, #tpu.memory_space<vmem>>, %arg5: memref<32x128xf32, #tpu.memory_space<vmem>>) attributes {dimension_semantics = [#tpu.dimension_semantics<parallel>, #tpu.dimension_semantics<arbitrary>], iteration_bounds = array<i64: 1, 1>, scalar_prefetch = 0 : i64, scratch_operands = 1 : i64, tpu.core_type = #tpu.core_type<tc>, window_params = [{transform_indices = @transform_0, window_bounds = array<i64: 32, 256>}, {transform_indices = @transform_1, window_bounds = array<i64: 32, 256>}, {transform_indices = @transform_2, window_bounds = array<i64: 32, 1>}]} {
    %c0_i32 = arith.constant 0 : i32
    %0 = arith.cmpi eq, %arg1, %c0_i32 : i32
    %1 = arith.extui %0 : i1 to i32
    %c0_i32_0 = arith.constant 0 : i32
    %2 = arith.cmpi ne, %1, %c0_i32_0 : i32
    scf.if %2 {
      %cst_14 = arith.constant 0.000000e+00 : f32
      %36 = vector.broadcast %cst_14 : f32 to vector<32x128xf32>
      %c0_15 = arith.constant 0 : index
      %c0_16 = arith.constant 0 : index
      %37 = vector.load %arg5[%c0_15, %c0_16] : memref<32x128xf32, #tpu.memory_space<vmem>>, vector<32x128xf32>
      tpu.vector_store %arg5[%c0_15, %c0_16], %36 {strides = array<i32>} : memref<32x128xf32, #tpu.memory_space<vmem>>, vector<32x128xf32>,
    } else {
    }
    %c0 = arith.constant 0 : index
    %c0_1 = arith.constant 0 : index
    %3 = vector.load %arg2[%c0, %c0_1] : memref<32x256xf32, #tpu.memory_space<vmem>>, vector<32x256xf32>
    %4 = math.absf %3 : vector<32x256xf32>
    %cst = arith.constant 2.010000e-02 : f32
    %5 = vector.broadcast %cst : f32 to vector<32x256xf32>
    %6 = arith.addf %4, %5 : vector<32x256xf32>
    %7 = arith.mulf %6, %6 : vector<32x256xf32>
    %cst_2 = arith.constant 4.080400e+00 : f32
    %8 = vector.broadcast %cst_2 : f32 to vector<32x256xf32>
    %9 = arith.addf %7, %8 : vector<32x256xf32>
    %10 = math.rsqrt %9 : vector<32x256xf32>
    %11 = arith.mulf %9, %10 : vector<32x256xf32>
    %12 = tpu.bitcast %3 : vector<32x256xf32> -> vector<32x256xi32>
    %c-2147483648_i32 = arith.constant -2147483648 : i32
    %13 = vector.broadcast %c-2147483648_i32 : i32 to vector<32x256xi32>
    %14 = arith.andi %12, %13 : vector<32x256xi32>
    %cst_3 = arith.constant 2.020100e+00 : f32
    %15 = vector.broadcast %cst_3 : f32 to vector<32x256xf32>
    %16 = arith.subf %11, %15 : vector<32x256xf32>
    %17 = tpu.bitcast %16 : vector<32x256xf32> -> vector<32x256xi32>
    %18 = arith.ori %17, %14 : vector<32x256xi32>
    %19 = tpu.bitcast %18 : vector<32x256xi32> -> vector<32x256xf32>
    %cst_4 = arith.constant 0.000000e+00 : f32
    %20 = vector.broadcast %cst_4 : f32 to vector<32x256xf32>
    %21 = arith.cmpf oeq, %3, %20 : vector<32x256xf32>
    %cst_5 = arith.constant 0.000000e+00 : f32
    %22 = vector.broadcast %cst_5 : f32 to vector<32x256xf32>
    %23 = arith.select %21, %22, %19 : vector<32x256xi1>, vector<32x256xf32>
    %c0_6 = arith.constant 0 : index
    %c0_7 = arith.constant 0 : index
    %24 = vector.load %arg3[%c0_6, %c0_7] : memref<32x256xf32, #tpu.memory_space<vmem>>, vector<32x256xf32>
    tpu.vector_store %arg3[%c0_6, %c0_7], %23 {strides = array<i32>} : memref<32x256xf32, #tpu.memory_space<vmem>>, vector<32x256xf32>,
    %25 = arith.mulf %6, %10 : vector<32x256xf32>
    %26 = vector.extract_strided_slice %25 {offsets = [0, 0], sizes = [32, 128], strides = [1, 1]} : vector<32x256xf32> to vector<32x128xf32>
    %27 = vector.extract_strided_slice %25 {offsets = [0, 128], sizes = [32, 128], strides = [1, 1]} : vector<32x256xf32> to vector<32x128xf32>
    %28 = arith.mulf %26, %27 : vector<32x128xf32>
    %c0_8 = arith.constant 0 : index
    %c0_9 = arith.constant 0 : index
    %29 = vector.load %arg5[%c0_8, %c0_9] : memref<32x128xf32, #tpu.memory_space<vmem>>, vector<32x128xf32>
    %30 = math.log %28 : vector<32x128xf32>
    %31 = arith.addf %29, %30 : vector<32x128xf32>
    %c0_10 = arith.constant 0 : index
    %c0_11 = arith.constant 0 : index
    %32 = vector.load %arg5[%c0_10, %c0_11] : memref<32x128xf32, #tpu.memory_space<vmem>>, vector<32x128xf32>
    tpu.vector_store %arg5[%c0_10, %c0_11], %31 {strides = array<i32>} : memref<32x128xf32, #tpu.memory_space<vmem>>, vector<32x128xf32>,
    %c0_i32_12 = arith.constant 0 : i32
    %33 = arith.cmpi eq, %arg1, %c0_i32_12 : i32
    %34 = arith.extui %33 : i1 to i32
    %c0_i32_13 = arith.constant 0 : i32
    %35 = arith.cmpi ne, %34, %c0_i32_13 : i32
    scf.if %35 {
      %c0_14 = arith.constant 0 : index
      %c0_15 = arith.constant 0 : index
      %36 = vector.load %arg5[%c0_14, %c0_15] : memref<32x128xf32, #tpu.memory_space<vmem>>, vector<32x128xf32>
      %cst_16 = arith.constant dense<0.000000e+00> : vector<32xf32>
      %37 = vector.multi_reduction <add>, %36, %cst_16 [1] : vector<32x128xf32> to vector<32xf32>
      %38 = vector.shape_cast %37 : vector<32xf32> to vector<32x1xf32>
      %c0_17 = arith.constant 0 : index
      %c0_18 = arith.constant 0 : index
      %39 = vector.load %arg4[%c0_17, %c0_18] : memref<32x1xf32, #tpu.memory_space<vmem>>, vector<32x1xf32>
      tpu.vector_store %arg4[%c0_17, %c0_18], %38 {strides = array<i32>} : memref<32x1xf32, #tpu.memory_space<vmem>>, vector<32x1xf32>,
    } else {
    }
    return
  }
  func.func @transform_0(%arg0: i32, %arg1: i32) -> (i32, i32) {
    %c0_i32 = arith.constant 0 : i32
    return %arg0, %arg1 : i32, i32
  }
  func.func @transform_1(%arg0: i32, %arg1: i32) -> (i32, i32) {
    %c0_i32 = arith.constant 0 : i32
    return %arg0, %arg1 : i32, i32
  }
  func.func @transform_2(%arg0: i32, %arg1: i32) -> (i32, i32) {
    %c0_i32 = arith.constant 0 : i32
    %c0_i32_0 = arith.constant 0 : i32
    return %arg0, %c0_i32 : i32, i32
  }
}

</mosaic_0001>

<bundles_post_ra>
// kernel: tpu_custom_call.1
= control target key start
LH: loop header
LB: loop body
LE: loop exit
PB: predicated region body
PF: predicated region fallthrough
CT: control target
= control target key end

     0   :  { %8 = vsyncpa [#allocation4], 0  ;;  %s429_s0 = inlined_call_operand.hbm [shape: f32[32,256], index: 0, kind: input, shape index: {}]   ;;  %s430_s1 = inlined_call_operand.hbm [shape: f32[32,256], index: 1, kind: output, shape index: {0}]   ;;  %s431_s2 = inlined_call_operand.vmem [shape: f32[32,1], index: 2, kind: output, shape index: {1}]  }
   0x1   :  { %9 = vsyncpa [#allocation5], 0  ;;  %s314_s9 = smov [#allocation3]  }
   0x2   :  { %s15_s10 = sshll.u32 %s314_s9, 4  ;;  %s16_s10 = int_to_ptr.vmem [resolvable:$true] %s15_s10 }
   0x3   :  { %s278_s11 = scalar_lea.vmem %s16_s10, 1024  ;;  %p283_p1 = scmp.lt.s32.totalorder %s16_s10, %s16_s10 }
   0x4   :  { %p279_p0 = scmp.ne.s32.totalorder %s16_s10, %s278_s11  ;;  %p284_p2 = scmp.lt.s32.totalorder %s278_s11, %s278_s11 }
   0x6   :  { %p285_p3 = por %p284_p2, %p283_p1 }
   0x8   :  { %p286_p4 = pnand %p285_p3, %p279_p0 }
   0xa   :  { %289 = shalt.err (!%p286_p4)
}
   0xb   :  { %s315_s12 = smov 256   ;;  %s316_s13 = smov 16  }
   0xc   :  { %21 = dma.hbm_to_vmem [thread:$0]  %s429_s0, 1024, %s16_s10, [#allocation4], %s315_s12, %s315_s12, %s316_s13  }
   0xd   :  { %310 = dma.done.wait [#allocation4], 1024  }
   0xe   :  { %311 = vsyncadd [#allocation4], 4294966272  ;;  %v339_v0 = vld [vmem:[#allocation3 + $0x20] sm:$0xff]  ;;  %v341_v1 = vld [vmem:[#allocation3 + $0x28] sm:$0xff]  ;;  %s317_s0 = smov [#allocation6]  }
   0xf   :  { %v343_v2 = vld [vmem:[#allocation3] sm:$0xff]  ;;  %v45_v3 = vand.u32 2147483647, %v339_v0  ;;  %v46_v4 = vand.u32 2147483647, %v341_v1  ;;  %v347_v5 = vld [vmem:[#allocation3 + $0x8] sm:$0xff] }
  0x10   :  { %v41_v6 = vand.u32 2147483647, %v343_v2  ;;  %v42_v9 = vand.u32 2147483647, %v347_v5  ;;  %v351_v11 = vld [vmem:[#allocation3 + $0x30] sm:$0xff]  ;;  %v355_v15 = vld [vmem:[#allocation3 + $0x38] sm:$0xff] }
  0x11   :  { %v53_v7 = vadd.f32 0.0201, %v45_v3  ;;  %v54_v8 = vadd.f32 0.0201, %v46_v4  ;;  %v47_v16 = vand.u32 2147483647, %v351_v11 }
  0x12   :  { %v49_v10 = vadd.f32 0.0201, %v41_v6  ;;  %v353_v14 = vadd.f32 0.0201, %v42_v9  ;;  %v48_v18 = vand.u32 2147483647, %v355_v15 }
  0x13   :  { %v61_v12 = vmul.f32 %v53_v7, %v53_v7  ;;  %v62_v13 = vmul.f32 %v54_v8, %v54_v8  ;;  %v359_v19 = vld [vmem:[#allocation3 + $0x10] sm:$0xff]  ;;  %v361_v20 = vld [vmem:[#allocation3 + $0x18] sm:$0xff]  ;;  %v55_v24 = vadd.f32 0.0201, %v47_v16  ;;  %v101_v40 = vand.u32 2147483648, %v339_v0  ;;  %s218_s16 = sshll.u32 %s317_s0, 4  ;;  %s219_s16 = int_to_ptr.vmem [resolvable:$true] %s218_s16 }
  0x14   :  { %v57_v17 = vmul.f32 %v49_v10, %v49_v10  ;;  %v58_v23 = vmul.f32 %v353_v14, %v353_v14  ;;  %v365_v26 = vadd.f32 0.0201, %v48_v18  ;;  %v43_v29 = vand.u32 2147483647, %v359_v19  ;;  %s290_s17 = scalar_lea.vmem %s219_s16, 1024  ;;  %p295_p6 = scmp.lt.s32.totalorder %s219_s16, %s219_s16 }
  0x15   :  { %v69_v21 = vadd.f32 4.0804, %v61_v12  ;;  %v70_v22 = vadd.f32 4.0804, %v62_v13  ;;  %v63_v28 = vmul.f32 %v55_v24, %v55_v24  ;;  %v44_v31 = vand.u32 2147483647, %v361_v20  ;;  %p291_p5 = scmp.ne.s32.totalorder %s219_s16, %s290_s17  ;;  %p296_p7 = scmp.lt.s32.totalorder %s290_s17, %s290_s17 }
  0x16   :  { %v65_v25 = vadd.f32 4.0804, %v57_v17  ;;  %v66_v27 = vadd.f32 4.0804, %v58_v23  ;;  %v64_v30 = vmul.f32 %v365_v26, %v365_v26  ;;  %v371_v33 = vadd.f32 0.0201, %v43_v29 }
  0x17   :  { %246 = vrsqrt.f32 %v69_v21  ;;  %v71_v32 = vadd.f32 4.0804, %v63_v28  ;;  %v373_v35 = vadd.f32 0.0201, %v44_v31  ;;  %v102_v41 = vand.u32 2147483648, %v341_v1  ;;  %p297_p8 = por %p296_p7, %p295_p6 }
  0x18   :  { %248 = vrsqrt.f32 %v70_v22  ;;  %v72_v34 = vadd.f32 4.0804, %v64_v30  ;;  %v59_v36 = vmul.f32 %v371_v33, %v371_v33  ;;  %vm141_vm0 = vcmp.eq.f32.partialorder %v339_v0, 0.0 }
  0x19   :  { %250 = vrsqrt.f32 %v65_v25  ;;  %v60_v37 = vmul.f32 %v373_v35, %v373_v35  ;;  %vm142_vm1 = vcmp.eq.f32.partialorder %v341_v1, 0.0  ;;  %v97_v42 = vand.u32 2147483648, %v343_v2  ;;  %p298_p9 = pnand %p297_p8, %p291_p5 }
  0x1a   :  { %252 = vrsqrt.f32 %v66_v27  ;;  %v67_v38 = vadd.f32 4.0804, %v59_v36  ;;  %v98_v44 = vand.u32 2147483648, %v347_v5  ;;  %vm137_vm2 = vcmp.eq.f32.partialorder %v343_v2, 0.0 }
  0x1b   :  { %254 = vrsqrt.f32 %v71_v32  ;;  %v68_v39 = vadd.f32 4.0804, %v60_v37  ;;  %vm138_vm3 = vcmp.eq.f32.partialorder %v347_v5, 0.0  ;;  %v103_v45 = vand.u32 2147483648, %v351_v11 }
  0x1c   :  { %256 = vrsqrt.f32 %v72_v34  ;;  %v104_v49 = vand.u32 2147483648, %v355_v15  ;;  %vm143_vm4 = vcmp.eq.f32.partialorder %v351_v11, 0.0  ;;  %vm144_vm5 = vcmp.eq.f32.partialorder %v355_v15, 0.0 }
  0x1d   :  { %258 = vrsqrt.f32 %v67_v38  ;;  %v99_v53 = vand.u32 2147483648, %v359_v19  ;;  %v100_v58 = vand.u32 2147483648, %v361_v20  ;;  %vm139_vm6 = vcmp.eq.f32.partialorder %v359_v19, 0.0 }
  0x1e   :  { %260 = vrsqrt.f32 %v68_v39  ;;  %vm140_vm7 = vcmp.eq.f32.partialorder %v361_v20, 0.0 }
  0x24   :  { %v247_v43 = vpop.eup %246 }
  0x25   :  { %v249_v46 = vpop.eup %248  ;;  %v165_v47 = vmul.f32 %v247_v43, %v53_v7  ;;  %v85_v48 = vmul.f32 %v247_v43, %v69_v21 }
  0x26   :  { %v251_v50 = vpop.eup %250  ;;  %v86_v51 = vmul.f32 %v249_v46, %v70_v22  ;;  %v166_v52 = vmul.f32 %v249_v46, %v54_v8 }
  0x27   :  { %v253_v54 = vpop.eup %252  ;;  %v238_v55 = vadd.f32 -2.0201, %v85_v48  ;;  %v161_v56 = vmul.f32 %v251_v50, %v49_v10  ;;  %v81_v57 = vmul.f32 %v251_v50, %v65_v25 }
  0x28   :  { %v255_v59 = vpop.eup %254  ;;  %v239_v60 = vadd.f32 -2.0201, %v86_v51  ;;  %v171_v61 = vmul.f32 %v166_v52, %v165_v47  ;;  %v82_v62 = vmul.f32 %v253_v54, %v66_v27  ;;  %v162_v63 = vmul.f32 %v253_v54, %v353_v14 }
  0x29   :  { %v257_v3 = vpop.eup %256  ;;  %v125_v4 = vor.u32 %v238_v55, %v101_v40  ;;  %v234_v6 = vadd.f32 -2.0201, %v81_v57  ;;  %v87_v7 = vmul.f32 %v255_v59, %v71_v32  ;;  %v167_v8 = vmul.f32 %v255_v59, %v55_v24 }
  0x2a   :  { %v126_v9 = vor.u32 %v239_v60, %v102_v41  ;;  %262 = vlog2.f32 %v171_v61  ;;  %v235_v12 = vadd.f32 -2.0201, %v82_v62  ;;  %v169_v13 = vmul.f32 %v162_v63, %v161_v56  ;;  %v259_v21 = vpop.eup %258 }
  0x2b   :  { %v149_v10 = vsel %vm141_vm0, 0.0, %v125_v4  ;;  %v121_v16 = vor.u32 %v234_v6, %v97_v42  ;;  %v88_v17 = vmul.f32 %v257_v3, %v72_v34  ;;  %v240_v18 = vadd.f32 -2.0201, %v87_v7  ;;  %v261_v24 = vpop.eup %260 }
  0x2c   :  { %v150_v22 = vsel %vm142_vm1, 0.0, %v126_v9  ;;  %157 = vst [vmem:[#allocation6 + $0x20] sm:$0xff] %v149_v10  ;;  %v122_v14 = vor.u32 %v235_v12, %v98_v44  ;;  %264 = vlog2.f32 %v169_v13  ;;  %v168_v23 = vmul.f32 %v257_v3, %v365_v26 }
  0x2d   :  { %158 = vst [vmem:[#allocation6 + $0x28] sm:$0xff] %v150_v22  ;;  %v145_v25 = vsel %vm137_vm2, 0.0, %v121_v16  ;;  %v241_v27 = vadd.f32 -2.0201, %v88_v17  ;;  %v127_v0 = vor.u32 %v240_v18, %v103_v45  ;;  %v83_v28 = vmul.f32 %v259_v21, %v67_v38 }
  0x2e   :  { %v146_v29 = vsel %vm138_vm3, 0.0, %v122_v14  ;;  %153 = vst [vmem:[#allocation6] sm:$0xff] %v145_v25  ;;  %v172_v30 = vmul.f32 %v168_v23, %v167_v8  ;;  %v84_v1 = vmul.f32 %v261_v24, %v68_v39  ;;  %v163_v31 = vmul.f32 %v259_v21, %v371_v33 }
  0x2f   :  { %154 = vst [vmem:[#allocation6 + $0x8] sm:$0xff] %v146_v29  ;;  %v128_v32 = vor.u32 %v241_v27, %v104_v49  ;;  %v151_v26 = vsel %vm143_vm4, 0.0, %v127_v0  ;;  %v236_v34 = vadd.f32 -2.0201, %v83_v28  ;;  %v164_v2 = vmul.f32 %v261_v24, %v373_v35 }
  0x30   :  { %159 = vst [vmem:[#allocation6 + $0x30] sm:$0xff] %v151_v26  ;;  %266 = vlog2.f32 %v172_v30  ;;  %v237_v36 = vadd.f32 -2.0201, %v84_v1 }
  0x31   :  { %v152_v5 = vsel %vm144_vm5, 0.0, %v128_v32  ;;  %v123_v37 = vor.u32 %v236_v34, %v99_v53  ;;  %v170_v33 = vmul.f32 %v164_v2, %v163_v31 }
  0x32   :  { %160 = vst [vmem:[#allocation6 + $0x38] sm:$0xff] %v152_v5  ;;  %v124_v38 = vor.u32 %v237_v36, %v100_v58 }
  0x33   :  { %v147_v39 = vsel %vm139_vm6, 0.0, %v123_v37  ;;  %268 = vlog2.f32 %v170_v33 }
  0x34   :  { %v148_v11 = vsel %vm140_vm7, 0.0, %v124_v38  ;;  %155 = vst [vmem:[#allocation6 + $0x10] sm:$0xff] %v147_v39 }
  0x35   :  { %156 = vst [vmem:[#allocation6 + $0x18] sm:$0xff] %v148_v11 }
  0x37   :  { %v263_v35 = vpop.eup %262 }
  0x38   :  { %v182_v40 = vmul.f32 0.6931472, %v263_v35 }
  0x39   :  { %v265_v41 = vpop.eup %264 }
  0x3a   :  { %204 = vadd.xlane.f32.xlu1 %v182_v40  ;;  %v178_v42 = vmul.f32 0.6931472, %v265_v41 }
  0x3c   :  { %200 = vadd.xlane.f32.xlu0 %v178_v42 }
  0x3d   :  { %v267_v19 = vpop.eup %266 }
  0x3e   :  { %v184_v15 = vmul.f32 0.6931472, %v267_v19 }
  0x40   :  { %v269_v43 = vpop.eup %268  ;;  %206 = vadd.xlane.f32.xlu1 %v184_v15 }
  0x41   :  { %v180_v44 = vmul.f32 0.6931472, %v269_v43 }
  0x43   :  { %202 = vadd.xlane.f32.xlu0 %v180_v44 }
  0x44   :  { %301 = shalt.err (!%p298_p9)
}
  0x45   :  { %224 = dma.vmem_to_hbm [thread:$0]  %s219_s16, 1024, %s430_s1, [#allocation5], %s315_s12, %s315_s12, %s316_s13   ;;  %vm208_vm8 = vcmask 7168  }
  0xc3   :  { %v205_v20 = vpop.xlane.xlu1 %204 }
  0xc4   :  { %211 = vst.msk [vmem:[%s431_s2 + $0x10] sm:$0xff] %vm208_vm8, %v205_v20 }
  0xc5   :  { %v201_v45 = vpop.xlane.xlu0 %200 }
  0xc6   :  { %209 = vst.msk [vmem:[%s431_s2] sm:$0xff] %vm208_vm8, %v201_v45 }
  0xc9   :  { %v207_v46 = vpop.xlane.xlu1 %206 }
  0xca   :  { %212 = vst.msk [vmem:[%s431_s2 + $0x18] sm:$0xff] %vm208_vm8, %v207_v46 }
  0xcc   :  { %v203_v47 = vpop.xlane.xlu0 %202 }
  0xcd   :  { %210 = vst.msk [vmem:[%s431_s2 + $0x8] sm:$0xff] %vm208_vm8, %v203_v47 }
  0xce   :  { %312 = dma.done.wait [#allocation5], 1024  }
  0xcf   :  { %313 = vsyncadd [#allocation5], 4294966272 }
  0xd0   :  { %232 = vsyncpa [#allocation4], 1 }
  0xd1   :  { %233 = vsyncpa [#allocation5], 1 }

</bundles_post_ra>
